<compile_context>
chip_gen: v5e
topology: v5e:2x2
jax: 0.10.0
libtpu: 0.0.40
codegen_flags: <defaults>
</compile_context>

<pallas_src>
from typing import NamedTuple, Optional

import jax
import jax.numpy as jnp
from jax.experimental import pallas as pl
from jax.experimental.pallas import tpu as pltpu


class EmbedReturn(NamedTuple):
    emb: Optional[jax.Array] = None
    time_emb: Optional[jax.Array] = None


def _nbytes(a) -> int:
    return int(a.size) * a.dtype.itemsize


# Whole-array resident VMEM operand (no blocking, single buffer).
_VMEM = pl.BlockSpec(memory_space=pltpu.MemorySpace.VMEM)


# ----------------------------------------------------------------------------
# Kernels
# ----------------------------------------------------------------------------
def _branch_mlp(x_ref, w1_ref, b1_ref, w2_ref, b2_ref):
    """One Linear -> SiLU -> Linear branch on VMEM refs; f32 result in vregs."""
    x = x_ref[...].astype(w1_ref.dtype)                      # bf16 for the MXU
    h = jnp.dot(x, w1_ref[...], preferred_element_type=jnp.float32)
    h = h + b1_ref[...].astype(jnp.float32)
    h = h * jax.nn.sigmoid(h)                                # SiLU in f32 (v5e-safe)
    y = jnp.dot(h.astype(w2_ref.dtype), w2_ref[...],
                preferred_element_type=jnp.float32)
    return y + b2_ref[...].astype(jnp.float32)


def _fused_concat_kernel(t_ref, p_ref,
                         tw1, tb1, tw2, tb2,
                         pw1, pb1, pw2, pb2, o_ref):
    """Both branch MLPs + concat in one kernel.  Used when the per-branch width
    is a multiple of 128, so the lane concat is tile-aligned and the single
    store is lane-dense."""
    yt = _branch_mlp(t_ref, tw1, tb1, tw2, tb2)              # (bb, half)
    yp = _branch_mlp(p_ref, pw1, pb1, pw2, pb2)              # (bb, half)
    o_ref[...] = jnp.concatenate([yt, yp], axis=1).astype(o_ref.dtype)


def _fused_add_kernel(t_ref, p_ref,
                      tw1, tb1, tw2, tb2,
                      pw1, pb1, pw2, pb2, o_ref):
    """Both branch MLPs in one kernel for small / unaligned configs: the
    second-layer weights & biases were column-placed into the padded, lane-dense
    output width at init, so the branches combine with a single VPU add (no
    unaligned lane shuffles) and are stored once."""
    yt = _branch_mlp(t_ref, tw1, tb1, tw2, tb2)              # (bb, out_padded)
    yp = _branch_mlp(p_ref, pw1, pb1, pw2, pb2)              # (bb, out_padded)
    o_ref[...] = (yt + yp).astype(o_ref.dtype)


def _mlp_kernel(x_ref, w1_ref, b1_ref, w2_ref, b2_ref, o_ref):
    """Single-branch Linear -> SiLU -> Linear (use_pos=False / fallback path)."""
    o_ref[...] = _branch_mlp(x_ref, w1_ref, b1_ref, w2_ref, b2_ref).astype(o_ref.dtype)


# ----------------------------------------------------------------------------
# pallas_call launcher (no-grid resident path / batch-tiled path)
# ----------------------------------------------------------------------------
def _run_mlp_call(kernel, xs, ws, d_out_padded, *, block_b, cost):
    """xs: batch-major activations (shared batch dim B); ws: weights/biases."""
    B = xs[0].shape[0]
    out_dtype = xs[0].dtype
    out_shape = jax.ShapeDtypeStruct((B, d_out_padded), out_dtype)

    if B <= block_b:
        # Common tiny-batch embedding case: everything resident in VMEM, no grid
        # (shortest prologue/epilogue, no pipeline machinery).
        return pl.pallas_call(
            kernel,
            out_shape=out_shape,
            in_specs=[_VMEM] * (len(xs) + len(ws)),
            out_specs=_VMEM,
            cost_estimate=cost,
        )(*xs, *ws)

    # Large batch: tile the batch axis.  pl.cdiv handles a non-divisible B
    # (edge blocks are masked) instead of falling back to a fully resident
    # block that can blow VMEM.  "parallel" lets v7x's 2 TensorCores split
    # the grid; block_b=256 keeps >=2 steps for realistic batches.
    block_b = max(8, (block_b // 8) * 8)
    grid = (pl.cdiv(B, block_b),)
    act_specs = [pl.BlockSpec((block_b, x.shape[1]), lambda i: (i, 0)) for x in xs]
    # Weights/biases stay resident in VMEM (single buffer, no per-step DMA)
    # rather than being double-buffered blocked operands.
    w_specs = [_VMEM] * len(ws)

    w_bytes = sum(_nbytes(w) for w in ws)
    act_bytes = 2 * block_b * (sum(x.shape[1] * x.dtype.itemsize for x in xs)
                               + d_out_padded * out_dtype.itemsize)
    vmem_limit = int(min(max(2 * (w_bytes + act_bytes), 16 << 20), 48 << 20))

    return pl.pallas_call(
        kernel,
        out_shape=out_shape,
        grid=grid,
        in_specs=act_specs + w_specs,
        out_specs=pl.BlockSpec((block_b, d_out_padded), lambda i: (i, 0)),
        compiler_params=pltpu.CompilerParams(
            dimension_semantics=("parallel",),
            vmem_limit_bytes=vmem_limit),
        cost_estimate=cost,
    )(*xs, *ws)


# ----------------------------------------------------------------------------
# Python wrappers
# ----------------------------------------------------------------------------
def fused_time_pos_mlp(t_x, p_x, t_params, p_params, *,
                       out_channels, out_padded, concat_combine, block_b=256):
    """Both branch MLPs + concat fused into ONE pallas_call."""
    kernel = _fused_concat_kernel if concat_combine else _fused_add_kernel
    ws = (*t_params, *p_params)
    tw1, _, tw2, _ = t_params
    pw1, _, pw2, _ = p_params
    B = t_x.shape[0]
    cost = pl.CostEstimate(
        flops=int(2 * B * (tw1.shape[0] * tw1.shape[1] + tw2.shape[0] * tw2.shape[1]
                           + pw1.shape[0] * pw1.shape[1] + pw2.shape[0] * pw2.shape[1])),
        transcendentals=int(B * (tw1.shape[1] + pw1.shape[1])),
        bytes_accessed=int(_nbytes(t_x) + _nbytes(p_x) + sum(_nbytes(w) for w in ws)
                           + B * out_padded * t_x.dtype.itemsize),
    )
    y = _run_mlp_call(kernel, (t_x, p_x), ws, out_padded, block_b=block_b, cost=cost)
    return y if out_padded == out_channels else y[:, :out_channels]


def mlp_silu_mlp(x, w1, b1, w2, b2, *, out_channels=None, block_b=256):
    """Single-branch fused Linear -> SiLU -> Linear (use_pos=False path)."""
    d_out = w2.shape[1]
    out_channels = d_out if out_channels is None else out_channels
    # Lane-dense output: pad the 2nd-layer output dim to a multiple of 128
    # (avoids masked vst.msk partial stores); padding is done outside the
    # kernel and sliced off afterwards.
    pad = (-d_out) % 128
    if pad:
        w2 = jnp.pad(w2, ((0, 0), (0, pad)))
        b2 = jnp.pad(b2, ((0, 0), (0, pad)))
    d_out_p = d_out + pad
    B = x.shape[0]
    ws = (w1, b1, w2, b2)
    cost = pl.CostEstimate(
        flops=int(2 * B * (w1.shape[0] * w1.shape[1] + w2.shape[0] * d_out_p)),
        transcendentals=int(B * w1.shape[1]),
        bytes_accessed=int(_nbytes(x) + sum(_nbytes(w) for w in ws)
                           + B * d_out_p * x.dtype.itemsize),
    )
    y = _run_mlp_call(_mlp_kernel, (x,), ws, d_out_p, block_b=block_b, cost=cost)
    return y if d_out_p == out_channels else y[:, :out_channels]


# ----------------------------------------------------------------------------
# Module: parameters + forward
# ----------------------------------------------------------------------------
class TimeStyleSeperateEmbed:
    def __init__(self, time_channels, time_out_channels, use_pos=True, *,
                 key, param_dtype=jnp.bfloat16):
        self.use_pos = use_pos
        self.time_channels = time_channels
        self.time_out_channels = time_out_channels
        out_chn = time_out_channels // 2 if use_pos else time_out_channels
        k = jax.random.split(key, 8)

        def linear_params(kw, kb, fan_in, fan_out):
            # nn.Linear-style uniform init.  Weights stored bf16 (MXU-native ->
            # half the weight DMA / VMEM), biases kept f32 (tiny, better accuracy).
            bound = 1.0 / float(fan_in) ** 0.5
            w = jax.random.uniform(kw, (fan_in, fan_out), jnp.float32, -bound, bound)
            b = jax.random.uniform(kb, (1, fan_out), jnp.float32, -bound, bound)
            return w.astype(param_dtype), b

        # time_embed: Linear(time_channels, out_chn) -> SiLU -> Linear(out_chn, out_chn)
        self.t_w1, self.t_b1 = linear_params(k[0], k[1], time_channels, out_chn)
        self.t_w2, self.t_b2 = linear_params(k[2], k[3], out_chn, out_chn)

        self.pos_embed = None
        if use_pos:
            half = time_out_channels // 2
            # pos_embed: Linear(128, half) -> SiLU -> Linear(half, half)
            self.p_w1, self.p_b1 = linear_params(k[4], k[5], 128, half)
            self.p_w2, self.p_b2 = linear_params(k[6], k[7], half, half)
            self.pos_embed = True

            # Kernel-ready fused-path parameters (built once at init).
            self._concat_ok = (half % 128) == 0
            if self._concat_ok:
                # Ideal layout: no structural zeros; the in-kernel lane concat of
                # the two (.., half) branch results is 128-aligned.
                self._out_padded = time_out_channels
                self._t_params_k = (self.t_w1, self.t_b1, self.t_w2, self.t_b2)
                self._p_params_k = (self.p_w1, self.p_b1, self.p_w2, self.p_b2)
            else:
                # Small / unaligned config: pad the fused output width to a
                # multiple of 128 and column-place each branch's 2nd-layer
                # weights/biases at its output offset.  Kernel combines the
                # branches with one VPU add; zero columns are sliced off outside.
                out_p = ((time_out_channels + 127) // 128) * 128
                self._out_padded = out_p

                def _place(w, b, col0):
                    wf = jnp.zeros((w.shape[0], out_p), w.dtype)
                    wf = wf.at[:, col0:col0 + w.shape[1]].set(w)
                    bf = jnp.zeros((1, out_p), b.dtype)
                    bf = bf.at[:, col0:col0 + b.shape[1]].set(b)
                    return wf, bf

                t_w2_k, t_b2_k = _place(self.t_w2, self.t_b2, 0)
                p_w2_k, p_b2_k = _place(self.p_w2, self.p_b2, half)
                self._t_params_k = (self.t_w1, self.t_b1, t_w2_k, t_b2_k)
                self._p_params_k = (self.p_w1, self.p_b1, p_w2_k, p_b2_k)

    def forward(self, time_emb=None, pos_emb=None, **kwargs):
        # Fast path: both embeddings present -> both branch MLPs run inside ONE
        # pallas_call; the concatenated result is stored lane-dense, once.
        if self.use_pos and time_emb is not None and pos_emb is not None:
            time_out = fused_time_pos_mlp(
                time_emb, pos_emb, self._t_params_k, self._p_params_k,
                out_channels=self.time_out_channels,
                out_padded=self._out_padded,
                concat_combine=self._concat_ok)
            return EmbedReturn(emb=None, time_emb=time_out)

        # General path mirroring the original PyTorch control flow
        # (e.g. use_pos=False, time_emb only).
        if time_emb is not None:
            time_emb = mlp_silu_mlp(time_emb, self.t_w1, self.t_b1,
                                    self.t_w2, self.t_b2)
        if pos_emb is not None:
            pos_emb = mlp_silu_mlp(pos_emb, self.p_w1, self.p_b1,
                                   self.p_w2, self.p_b2)
        else:
            assert self.pos_embed is None
        time_out = time_emb if pos_emb is None else jnp.concatenate(
            [time_emb, pos_emb], axis=1)
        return EmbedReturn(emb=None, time_emb=time_out)

    __call__ = forward


# ----------------------------------------------------------------------------
# Reference (pure JAX) emulating the kernel's bf16-input / f32-accumulate math
# ----------------------------------------------------------------------------
def _ref_mlp(x, w1, b1, w2, b2):
    f32 = jnp.float32
    xq = x.astype(jnp.bfloat16).astype(f32)
    h = xq @ w1.astype(f32) + b1.astype(f32)
    h = h * jax.nn.sigmoid(h)
    hq = h.astype(jnp.bfloat16).astype(f32)
    return hq @ w2.astype(f32) + b2.astype(f32)


if __name__ == "__main__":
    key = jax.random.PRNGKey(0)
    k_mod, k_t, k_p = jax.random.split(key, 3)

    batch = 8
    time_channels = 32
    pos_channels = 128

    time_in = jax.random.normal(k_t, (batch, time_channels), jnp.float32)
    pos_in = jax.random.normal(k_p, (batch, pos_channels), jnp.float32)

    # --- 1) use_pos=True, small output (64): add-combine fused kernel --------
    mod = TimeStyleSeperateEmbed(time_channels, 64, use_pos=True, key=k_mod)
    out = mod.forward(time_emb=time_in, pos_emb=pos_in)
    time_out = jax.block_until_ready(out.time_emb)

    ref_t = _ref_mlp(time_in, mod.t_w1, mod.t_b1, mod.t_w2, mod.t_b2)
    ref_p = _ref_mlp(pos_in, mod.p_w1, mod.p_b1, mod.p_w2, mod.p_b2)
    ref = jnp.concatenate([ref_t, ref_p], axis=1)

    assert out.emb is None
    assert time_out.shape == (batch, 64)
    assert time_out.dtype == jnp.float32
    assert jnp.allclose(time_out, ref, atol=2e-2, rtol=2e-2), \
        float(jnp.max(jnp.abs(time_out - ref)))

    # --- 2) use_pos=True, 128-aligned half (out=256): concat fused kernel ----
    mod2 = TimeStyleSeperateEmbed(time_channels, 256, use_pos=True, key=k_mod)
    out2 = mod2.forward(time_emb=time_in, pos_emb=pos_in)
    time_out2 = jax.block_until_ready(out2.time_emb)

    ref2 = jnp.concatenate(
        [_ref_mlp(time_in, mod2.t_w1, mod2.t_b1, mod2.t_w2, mod2.t_b2),
         _ref_mlp(pos_in, mod2.p_w1, mod2.p_b1, mod2.p_w2, mod2.p_b2)], axis=1)
    assert time_out2.shape == (batch, 256)
    assert jnp.allclose(time_out2, ref2, atol=2e-2, rtol=2e-2), \
        float(jnp.max(jnp.abs(time_out2 - ref2)))

    # --- 3) use_pos=False single-branch path ----------------------------------
    mod_np = TimeStyleSeperateEmbed(time_channels, 64, use_pos=False, key=k_mod)
    out_np = mod_np.forward(time_emb=time_in, pos_emb=None)
    tout_np = jax.block_until_ready(out_np.time_emb)
    ref_np = _ref_mlp(time_in, mod_np.t_w1, mod_np.t_b1, mod_np.t_w2, mod_np.t_b2)
    assert tout_np.shape == (batch, 64)
    assert jnp.allclose(tout_np, ref_np, atol=2e-2, rtol=2e-2), \
        float(jnp.max(jnp.abs(tout_np - ref_np)))

    print("KERNEL_OK")
</pallas_src>

<mosaic_0001>
module attributes {stable_mosaic.version = 11 : i64} {
  func.func @_fused_add_kernel(%arg0: memref<8x32xf32, #tpu.memory_space<vmem>>, %arg1: memref<8x128xf32, #tpu.memory_space<vmem>>, %arg2: memref<32x32xbf16, #tpu.memory_space<vmem>>, %arg3: memref<1x32xf32, #tpu.memory_space<vmem>>, %arg4: memref<32x128xbf16, #tpu.memory_space<vmem>>, %arg5: memref<1x128xf32, #tpu.memory_space<vmem>>, %arg6: memref<128x32xbf16, #tpu.memory_space<vmem>>, %arg7: memref<1x32xf32, #tpu.memory_space<vmem>>, %arg8: memref<32x128xbf16, #tpu.memory_space<vmem>>, %arg9: memref<1x128xf32, #tpu.memory_space<vmem>>, %arg10: memref<8x128xf32, #tpu.memory_space<vmem>>) attributes {dimension_semantics = [], scalar_prefetch = 0 : i64, scratch_operands = 0 : i64, tpu.core_type = #tpu.core_type<tc>} {
    %c0 = arith.constant 0 : index
    %c0_0 = arith.constant 0 : index
    %0 = vector.load %arg0[%c0, %c0_0] : memref<8x32xf32, #tpu.memory_space<vmem>>, vector<8x32xf32>
    %1 = arith.truncf %0 : vector<8x32xf32> to vector<8x32xbf16>
    %c0_1 = arith.constant 0 : index
    %c0_2 = arith.constant 0 : index
    %2 = vector.load %arg2[%c0_1, %c0_2] : memref<32x32xbf16, #tpu.memory_space<vmem>>, vector<32x32xbf16>
    %cst = arith.constant dense<0.000000e+00> : vector<8x32xf32>
    %3 = tpu.matmul %1, %2, %cst {dimension_numbers = #tpu.dot_dimension_numbers<[1], [0], [0], [1], [0, 0, 1, 1], [], []>} : vector<8x32xbf16>, vector<32x32xbf16>, vector<8x32xf32> -> vector<8x32xf32>
    %c0_3 = arith.constant 0 : index
    %c0_4 = arith.constant 0 : index
    %4 = vector.load %arg3[%c0_3, %c0_4] : memref<1x32xf32, #tpu.memory_space<vmem>>, vector<1x32xf32>
    %5 = vector.broadcast %4 : vector<1x32xf32> to vector<8x32xf32>
    %6 = arith.addf %3, %5 : vector<8x32xf32>
    %7 = arith.negf %6 : vector<8x32xf32>
    %8 = math.exp %7 : vector<8x32xf32>
    %cst_5 = arith.constant 1.000000e+00 : f32
    %9 = vector.broadcast %cst_5 : f32 to vector<8x32xf32>
    %10 = arith.addf %9, %8 : vector<8x32xf32>
    %11 = arith.divf %9, %10 : vector<8x32xf32>
    %12 = arith.mulf %6, %11 : vector<8x32xf32>
    %13 = arith.truncf %12 : vector<8x32xf32> to vector<8x32xbf16>
    %c0_6 = arith.constant 0 : index
    %c0_7 = arith.constant 0 : index
    %14 = vector.load %arg4[%c0_6, %c0_7] : memref<32x128xbf16, #tpu.memory_space<vmem>>, vector<32x128xbf16>
    %cst_8 = arith.constant dense<0.000000e+00> : vector<8x128xf32>
    %15 = tpu.matmul %13, %14, %cst_8 {dimension_numbers = #tpu.dot_dimension_numbers<[1], [0], [0], [1], [0, 0, 1, 1], [], []>} : vector<8x32xbf16>, vector<32x128xbf16>, vector<8x128xf32> -> vector<8x128xf32>
    %c0_9 = arith.constant 0 : index
    %c0_10 = arith.constant 0 : index
    %16 = vector.load %arg5[%c0_9, %c0_10] : memref<1x128xf32, #tpu.memory_space<vmem>>, vector<1x128xf32>
    %17 = vector.broadcast %16 : vector<1x128xf32> to vector<8x128xf32>
    %18 = arith.addf %15, %17 : vector<8x128xf32>
    %c0_11 = arith.constant 0 : index
    %c0_12 = arith.constant 0 : index
    %19 = vector.load %arg1[%c0_11, %c0_12] : memref<8x128xf32, #tpu.memory_space<vmem>>, vector<8x128xf32>
    %20 = arith.truncf %19 : vector<8x128xf32> to vector<8x128xbf16>
    %c0_13 = arith.constant 0 : index
    %c0_14 = arith.constant 0 : index
    %21 = vector.load %arg6[%c0_13, %c0_14] : memref<128x32xbf16, #tpu.memory_space<vmem>>, vector<128x32xbf16>
    %cst_15 = arith.constant dense<0.000000e+00> : vector<8x32xf32>
    %22 = tpu.matmul %20, %21, %cst_15 {dimension_numbers = #tpu.dot_dimension_numbers<[1], [0], [0], [1], [0, 0, 1, 1], [], []>} : vector<8x128xbf16>, vector<128x32xbf16>, vector<8x32xf32> -> vector<8x32xf32>
    %c0_16 = arith.constant 0 : index
    %c0_17 = arith.constant 0 : index
    %23 = vector.load %arg7[%c0_16, %c0_17] : memref<1x32xf32, #tpu.memory_space<vmem>>, vector<1x32xf32>
    %24 = vector.broadcast %23 : vector<1x32xf32> to vector<8x32xf32>
    %25 = arith.addf %22, %24 : vector<8x32xf32>
    %26 = arith.negf %25 : vector<8x32xf32>
    %27 = math.exp %26 : vector<8x32xf32>
    %cst_18 = arith.constant 1.000000e+00 : f32
    %28 = vector.broadcast %cst_18 : f32 to vector<8x32xf32>
    %29 = arith.addf %28, %27 : vector<8x32xf32>
    %30 = arith.divf %28, %29 : vector<8x32xf32>
    %31 = arith.mulf %25, %30 : vector<8x32xf32>
    %32 = arith.truncf %31 : vector<8x32xf32> to vector<8x32xbf16>
    %c0_19 = arith.constant 0 : index
    %c0_20 = arith.constant 0 : index
    %33 = vector.load %arg8[%c0_19, %c0_20] : memref<32x128xbf16, #tpu.memory_space<vmem>>, vector<32x128xbf16>
    %cst_21 = arith.constant dense<0.000000e+00> : vector<8x128xf32>
    %34 = tpu.matmul %32, %33, %cst_21 {dimension_numbers = #tpu.dot_dimension_numbers<[1], [0], [0], [1], [0, 0, 1, 1], [], []>} : vector<8x32xbf16>, vector<32x128xbf16>, vector<8x128xf32> -> vector<8x128xf32>
    %c0_22 = arith.constant 0 : index
    %c0_23 = arith.constant 0 : index
    %35 = vector.load %arg9[%c0_22, %c0_23] : memref<1x128xf32, #tpu.memory_space<vmem>>, vector<1x128xf32>
    %36 = vector.broadcast %35 : vector<1x128xf32> to vector<8x128xf32>
    %37 = arith.addf %34, %36 : vector<8x128xf32>
    %38 = arith.addf %18, %37 : vector<8x128xf32>
    %c0_24 = arith.constant 0 : index
    %c0_25 = arith.constant 0 : index
    %39 = vector.load %arg10[%c0_24, %c0_25] : memref<8x128xf32, #tpu.memory_space<vmem>>, vector<8x128xf32>
    tpu.vector_store %arg10[%c0_24, %c0_25], %38 {strides = array<i32>} : memref<8x128xf32, #tpu.memory_space<vmem>>, vector<8x128xf32>,
    return
  }
}

</mosaic_0001>

<bundles_post_ra>
// kernel: tpu_custom_call.1
= control target key start
LH: loop header
LB: loop body
LE: loop exit
PB: predicated region body
PF: predicated region fallthrough
CT: control target
= control target key end

     0   :  { %s527_s0 = inlined_call_operand.vmem [shape: f32[8,32], index: 0, kind: input, shape index: {}]   ;;  %s528_s1 = inlined_call_operand.vmem [shape: f32[8,128], index: 1, kind: input, shape index: {}]   ;;  %s529_s2 = inlined_call_operand.vmem [shape: bf16[32,32], index: 2, kind: input, shape index: {}]   ;;  %s530_s3 = inlined_call_operand.vmem [shape: f32[1,32], index: 3, kind: input, shape index: {}]   ;;  %s531_s4 = inlined_call_operand.vmem [shape: bf16[32,128], index: 4, kind: input, shape index: {}]   ;;  %s532_s5 = inlined_call_operand.vmem [shape: f32[1,128], index: 5, kind: input, shape index: {}]   ;;  %s533_s6 = inlined_call_operand.vmem [shape: bf16[128,32], index: 6, kind: input, shape index: {}]   ;;  %s534_s7 = inlined_call_operand.vmem [shape: f32[1,32], index: 7, kind: input, shape index: {}]   ;;  %s535_s8 = inlined_call_operand.vmem [shape: bf16[32,128], index: 8, kind: input, shape index: {}]   ;;  %s536_s9 = inlined_call_operand.vmem [shape: f32[1,128], index: 9, kind: input, shape index: {}]   ;;  %s537_s10 = inlined_call_operand.hbm [shape: f32[8,128], index: 10, kind: output, shape index: {}]  }
   0x1   :  { %v353_v0 = vld [vmem:[%s529_s2 + $0x8] sm:$0xff]  ;;  %v363_v1 = vld [vmem:[%s533_s6 + $0x38] sm:$0xff]  ;;  %v352_v2 = vld [vmem:[%s529_s2] sm:$0xff] }
   0x2   :  { %69 = vmatpush.bf16.msra.mxu0 %v353_v0  ;;  %203 = vmatpush.bf16.msra.mxu2 %v363_v1  ;;  %v362_v3 = vld [vmem:[%s533_s6 + $0x30] sm:$0xff]  ;;  %v37_v4 = vld [vmem:[%s527_s0] sm:$0xff] }
   0x3   :  { %v38_v5 = vpack.c.bf16 %v37_v4, %v37_v4 }
   0x4   :  { %15 = vsyncpa [#allocation3], 0  ;;  %vm59_vm0 = vcmask 261120   ;;  %v361_v6 = vld [vmem:[%s533_s6 + $0x28] sm:$0xff]  ;;  %v360_v7 = vld [vmem:[%s533_s6 + $0x20] sm:$0xff]  ;;  %s405_s2 = smov [#allocation2]  }
   0x5   :  { %v359_v8 = vld [vmem:[%s533_s6 + $0x18] sm:$0xff]  ;;  %v358_v9 = vld [vmem:[%s533_s6 + $0x10] sm:$0xff]  ;;  %v357_v10 = vld [vmem:[%s533_s6 + $0x8] sm:$0xff]  ;;  %s280_s25 = sshll.u32 %s405_s2, 4  ;;  %s282_s0 = sshll.u32 %s537_s10, 4  ;;  %s281_s25 = int_to_ptr.vmem [resolvable:$true] %s280_s25  ;;  %s283_s0 = int_to_ptr.hbm [resolvable:$true] %s282_s0 }
   0x6   :  { %70 = vmatpush.bf16.msra.mxu0 %v352_v2  ;;  %204 = vmatpush.bf16.msra.mxu2 %v362_v3  ;;  %v356_v11 = vld [vmem:[%s533_s6] sm:$0xff]  ;;  %v355_v14 = vld [vmem:[%s531_s4 + $0x8] sm:$0xff] }
   0x7   :  { %v133_v12 = vld [vmem:[%s528_s1] sm:$0xff]  ;;  %126 = vmatpush.bf16.msra.mxu1 %v355_v14  ;;  %v365_v28 = vld [vmem:[%s535_s8 + $0x8] sm:$0xff] }
   0x8   :  { %v134_v13 = vpack.c.bf16 %v133_v12, %v133_v12  ;;  %v367_v15 = vld [vmem:[%s530_s3] ss:$0 sm:$0xff]  ;;  %266 = vmatpush.bf16.msra.mxu3 %v365_v28 }
   0x9   :  { %299 = vmatmul.msk.bf16.vlgmr.msra.gmra.mxu0 %vm59_vm0, %v38_v5  ;;  %v354_v16 = vld [vmem:[%s531_s4] sm:$0xff] }
   0xa   :  { %205 = vmatpush.bf16.msra.mxu2 %v361_v6  ;;  %v368_v32 = vld [vmem:[%s534_s7] ss:$0 sm:$0xff] }
   0xb   :  { %127 = vmatpush.bf16.msra.mxu1 %v354_v16  ;;  %v364_v33 = vld [vmem:[%s535_s8] sm:$0xff] }
   0xc   :  { %267 = vmatpush.bf16.msra.mxu3 %v364_v33  ;;  %v369_v58 = vld [vmem:[%s532_s5] ss:$0 sm:$0xff] }
   0xd   :  { %v370_v59 = vld [vmem:[%s536_s9] ss:$0 sm:$0xff] }
   0xe   :  { %206 = vmatpush.bf16.msra.mxu2 %v360_v7 }
  0x12   :  { %207 = vmatpush.bf16.msra.mxu2 %v359_v8 }
  0x16   :  { %208 = vmatpush.bf16.msra.mxu2 %v358_v9 }
  0x1a   :  { %209 = vmatpush.bf16.msra.mxu2 %v357_v10 }
  0x1e   :  { %210 = vmatpush.bf16.msra.mxu2 %v356_v11 }
  0x21   :  { %211 = vmatmul.bf16.vlgmr.msra.gmra.mxu2 %v134_v13 }
  0x86   :  { %v72_v17 = vpop.f32.mrf.mxu0 }
  0x87   :  { %v73_v18 = vadd.f32 %v367_v15, %v72_v17 }
  0x89   :  { %v300_v19 = vmul.f32 -1.442695, %v73_v18 }
  0x8b   :  { %371 = vpow2.f32 %v300_v19 }
  0x8e   :  { %v74_v20 = vpop.f32.mrf.mxu0 }
  0x91   :  { %v372_v21 = vpop.eup %371 }
  0x92   :  { %v79_v22 = vadd.f32 1.0, %v372_v21 }
  0x94   :  { %373 = vrcp.f32 %v79_v22  ;;  %v91_v25 = vand.u32 2147483648, %v79_v22  ;;  %vm85_vm1 = vweird.f32 %v79_v22  ;;  %v89_v27 = vand.u32 2147483647, %v79_v22 }
  0x96   :  { %v92_v30 = vor.u32 1.1754944e-38, %v91_v25  ;;  %vm90_vm4 = vcmp.eq.f32.partialorder %v89_v27, 8.507059e+37 }
  0x9a   :  { %v374_v23 = vpop.eup %373 }
  0x9b   :  { %v81_v24 = vmul.f32 %v374_v23, %v79_v22  ;;  %vm86_vm2 = vweird.f32 %v374_v23 }
  0x9c   :  { %vm87_vm3 = vmor %vm85_vm1, %vm86_vm2 }
  0x9d   :  { %v82_v26 = vsub.f32 1.0, %v81_v24 }
  0x9f   :  { %v83_v29 = vmul.f32 %v374_v23, %v82_v26 }
  0xa1   :  { %v84_v31 = vadd.f32 %v374_v23, %v83_v29 }
  0xa3   :  { %v88_v34 = vsel %vm87_vm3, %v374_v23, %v84_v31 }
  0xa4   :  { %v93_v35 = vsel %vm90_vm4, %v92_v30, %v88_v34  ;;  %v212_v36 = vpop.f32.mrf.mxu2 }
  0xa5   :  { %v95_v37 = vmul.f32 %v93_v35, %v73_v18  ;;  %v213_v38 = vadd.f32 %v368_v32, %v212_v36 }
  0xa7   :  { %v96_v39 = vpack.c.bf16 %v95_v37, %v95_v37  ;;  %v342_v40 = vmul.f32 -1.442695, %v213_v38 }
  0xa9   :  { %375 = vpow2.f32 %v342_v40  ;;  %309 = vmatmul.msk.bf16.vlgmr.msra.gmra.mxu1 %vm59_vm0, %v96_v39 }
  0xac   :  { %v214_v41 = vpop.f32.mrf.mxu2 }
  0xaf   :  { %v376_v42 = vpop.eup %375 }
  0xb0   :  { %v219_v43 = vadd.f32 1.0, %v376_v42 }
  0xb2   :  { %377 = vrcp.f32 %v219_v43  ;;  %v231_v47 = vand.u32 2147483648, %v219_v43  ;;  %v229_v49 = vand.u32 2147483647, %v219_v43  ;;  %vm225_vm6 = vweird.f32 %v219_v43 }
  0xb4   :  { %v232_v51 = vor.u32 1.1754944e-38, %v231_v47  ;;  %vm230_vm8 = vcmp.eq.f32.partialorder %v229_v49, 8.507059e+37 }
  0xb8   :  { %v378_v44 = vpop.eup %377 }
  0xb9   :  { %v221_v45 = vmul.f32 %v378_v44, %v219_v43  ;;  %vm226_vm5 = vweird.f32 %v378_v44 }
  0xba   :  { %vm227_vm7 = vmor %vm225_vm6, %vm226_vm5 }
  0xbb   :  { %v222_v46 = vsub.f32 1.0, %v221_v45 }
  0xbd   :  { %v223_v48 = vmul.f32 %v378_v44, %v222_v46 }
  0xbf   :  { %v224_v50 = vadd.f32 %v378_v44, %v223_v48 }
  0xc1   :  { %v228_v52 = vsel %vm227_vm7, %v378_v44, %v224_v50 }
  0xc2   :  { %v233_v53 = vsel %vm230_vm8, %v232_v51, %v228_v52 }
  0xc3   :  { %v235_v54 = vmul.f32 %v233_v53, %v213_v38 }
  0xc5   :  { %v236_v55 = vpack.c.bf16 %v235_v54, %v235_v54 }
  0xc7   :  { %351 = vmatmul.msk.bf16.vlgmr.msra.gmra.mxu3 %vm59_vm0, %v236_v55 }
 0x126   :  { %v129_v56 = vpop.f32.mrf.mxu1 }
 0x127   :  { %v130_v61 = vadd.f32 %v369_v58, %v129_v56 }
 0x12e   :  { %v131_v57 = vpop.f32.mrf.mxu1 }
 0x14a   :  { %v269_v60 = vpop.f32.mrf.mxu3 }
 0x14b   :  { %v270_v62 = vadd.f32 %v370_v59, %v269_v60 }
 0x14d   :  { %v273_v63 = vadd.f32 %v270_v62, %v130_v61 }
 0x14f   :  { %274 = vst [vmem:[#allocation2] sm:$0xff] %v273_v63 }
 0x150   :  { %285 = dma.vmem_to_hbm [thread:$0]  %s281_s25, 128, %s283_s0, [#allocation3]  }
 0x152   :  { %v271_v0 = vpop.f32.mrf.mxu3 }
 0x153   :  { %403 = dma.done.wait [#allocation3], 128  }
 0x154   :  { %404 = vsyncadd [#allocation3], 4294967168 }
 0x155   :  { %290 = vsyncpa [#allocation3], 1 }

</bundles_post_ra>
